<compile_context>
chip_gen: v7x
topology: tpu7x:2x2x1
jax: 0.10.0
libtpu: 0.0.40
codegen_flags: <defaults>
</compile_context>

<pallas_src>
import functools

import jax
import jax.numpy as jnp
from jax.experimental import pallas as pl
from jax.experimental.pallas import tpu as pltpu


def _fused_boost_kernel(x_ref, w1_ref, b1_ref, w2_ref, b2_ref, o_ref):
    """Single-step fused boosted MLP: two matmuls + f32 epilogue."""
    x = x_ref[...]                                   # (tB, d_in)   bf16
    # First matmul: (tB, d_in) @ (d_in, Hp) -> f32 accumulate.
    h = jnp.dot(x, w1_ref[...], preferred_element_type=jnp.float32)
    # Bias + ReLU epilogue in f32 (VPU work, free under the MXU; v5e-safe).
    h = jnp.maximum(h + b1_ref[...], 0.0)            # (tB, Hp)     f32
    # Second matmul: model reduction fused into K = Hp.
    y = jnp.dot(h.astype(w2_ref.dtype), w2_ref[...],
                preferred_element_type=jnp.float32)  # (tB, d_out)  f32
    o_ref[...] = (y + b2_ref[...]).astype(o_ref.dtype)


def _round_up(x, m):
    return ((x + m - 1) // m) * m


@functools.partial(jax.jit, static_argnames=("max_batch_tile",))
def residuals_boost_forward(x, w1, b1, w2, b2, *, max_batch_tile=512):
    """Eval-mode forward: sum of per-model MLP outputs (fused into 2 matmuls).

    x:  (batch, d_in)        f32
    w1: (M, d_in, hid)       f32
    b1: (M, 1, hid)          f32
    w2: (M, hid, d_out)      f32
    b2: (M, 1, d_out)        f32
    """
    num_models, d_in, hid = w1.shape
    _, _, d_out = w2.shape
    batch = x.shape[0]

    # ---- Wrapper-side fusion of the model axis into K (done once, outside
    # ---- the hot path; numerically exact).
    hf = num_models * hid
    hp = _round_up(hf, 128)                                  # 192 -> 256: MXU fill + lane-dense
    w1f = jnp.transpose(w1, (1, 0, 2)).reshape(d_in, hf)     # (d_in, M*hid)
    b1f = b1.reshape(1, hf)                                  # (1,   M*hid)
    w2f = w2.reshape(hf, d_out)                              # (M*hid, d_out)
    b2s = jnp.sum(b2, axis=0)                                # (1,   d_out)
    if hp > hf:
        pad = hp - hf
        w1f = jnp.pad(w1f, ((0, 0), (0, pad)))               # zero cols -> h_pad = relu(0) = 0
        b1f = jnp.pad(b1f, ((0, 0), (0, pad)))
        w2f = jnp.pad(w2f, ((0, pad), (0, 0)))               # zero rows kill padded h anyway

    # MXU-native bf16 inputs; f32 accumulation inside the kernel.
    x_bf = x.astype(jnp.bfloat16)
    w1f = w1f.astype(jnp.bfloat16)
    w2f = w2f.astype(jnp.bfloat16)
    b1f = b1f.astype(jnp.float32)
    b2s = b2s.astype(jnp.float32)

    # ---- Batch tiling: single "parallel" grid axis (v7x 2-TC / megacore
    # ---- sharding once batch scales; 1 step at toy sizes).
    tile_b = batch if batch <= max_batch_tile else max_batch_tile
    if batch % tile_b != 0:
        tile_b = batch
    grid = (batch // tile_b,)

    return pl.pallas_call(
        _fused_boost_kernel,
        out_shape=jax.ShapeDtypeStruct((batch, d_out), jnp.float32),
        grid_spec=pl.GridSpec(
            grid=grid,
            in_specs=[
                pl.BlockSpec((tile_b, d_in), lambda i: (i, 0)),   # X tile
                pl.BlockSpec((d_in, hp), lambda i: (0, 0)),       # W1 fused (shared)
                pl.BlockSpec((1, hp), lambda i: (0, 0)),          # b1 fused (shared)
                pl.BlockSpec((hp, d_out), lambda i: (0, 0)),      # W2 fused (shared)
                pl.BlockSpec((1, d_out), lambda i: (0, 0)),       # sum(b2)  (shared)
            ],
            out_specs=pl.BlockSpec((tile_b, d_out), lambda i: (i, 0)),
        ),
        compiler_params=pltpu.CompilerParams(
            dimension_semantics=("parallel",),
        ),
    )(x_bf, w1f, b1f, w2f, b2s)


def _reference(x, w1, b1, w2, b2):
    """Pure-JAX reference of the boosted sum (mirrors the PyTorch eval path,
    with the same bf16 matmul inputs / f32 accumulation as the kernel)."""
    xb = x.astype(jnp.bfloat16)
    y = jnp.zeros((x.shape[0], w2.shape[-1]), jnp.float32)
    for m in range(w1.shape[0]):
        h = jnp.dot(xb, w1[m].astype(jnp.bfloat16),
                    preferred_element_type=jnp.float32) + b1[m]
        h = jnp.maximum(h, 0.0)
        y = y + jnp.dot(h.astype(jnp.bfloat16), w2[m].astype(jnp.bfloat16),
                        preferred_element_type=jnp.float32) + b2[m]
    return y


if __name__ == "__main__":
    # Small, deterministic synthetic setup matching the module's eval path.
    num_models = 3
    batch, d_in, hid, d_out = 8, 32, 64, 32

    key = jax.random.PRNGKey(0)
    k_x, k_w1, k_b1, k_w2, k_b2 = jax.random.split(key, 5)

    x = jax.random.normal(k_x, (batch, d_in), jnp.float32)
    w1 = jax.random.normal(k_w1, (num_models, d_in, hid), jnp.float32) * 0.1
    b1 = jax.random.normal(k_b1, (num_models, 1, hid), jnp.float32) * 0.1
    w2 = jax.random.normal(k_w2, (num_models, hid, d_out), jnp.float32) * 0.1
    b2 = jax.random.normal(k_b2, (num_models, 1, d_out), jnp.float32) * 0.1

    y = residuals_boost_forward(x, w1, b1, w2, b2)
    y = jax.block_until_ready(y)

    y_ref = _reference(x, w1, b1, w2, b2)
    assert y.shape == (batch, d_out)
    assert jnp.allclose(y, y_ref, atol=5e-3, rtol=5e-3), "mismatch vs reference"

    # NOTE: the PyTorch module's training-mode branch returns a Python list of
    # per-model predictions (no fused reduction), and the output_key branch
    # returns dicts; both are host-level control flow around the same per-model
    # forward — only the eval-mode boosted sum is the fused hot path here.
    print("KERNEL_OK")
</pallas_src>

<mosaic_0001>
module attributes {stable_mosaic.version = 11 : i64} {
  func.func @_fused_boost_kernel(%arg0: i32, %arg1: memref<8x32xbf16, #tpu.memory_space<vmem>>, %arg2: memref<32x256xbf16, #tpu.memory_space<vmem>>, %arg3: memref<1x256xf32, #tpu.memory_space<vmem>>, %arg4: memref<256x32xbf16, #tpu.memory_space<vmem>>, %arg5: memref<1x32xf32, #tpu.memory_space<vmem>>, %arg6: memref<8x32xf32, #tpu.memory_space<vmem>>) attributes {dimension_semantics = [#tpu.dimension_semantics<parallel>], iteration_bounds = array<i64: 1>, scalar_prefetch = 0 : i64, scratch_operands = 0 : i64, tpu.core_type = #tpu.core_type<tc>, window_params = [{transform_indices = @transform_0, window_bounds = array<i64: 8, 32>}, {pipeline_mode = #tpu.pipeline_mode<synchronous>, transform_indices = @transform_1, window_bounds = array<i64: 32, 256>}, {pipeline_mode = #tpu.pipeline_mode<synchronous>, transform_indices = @transform_2, window_bounds = array<i64: 1, 256>}, {pipeline_mode = #tpu.pipeline_mode<synchronous>, transform_indices = @transform_3, window_bounds = array<i64: 256, 32>}, {pipeline_mode = #tpu.pipeline_mode<synchronous>, transform_indices = @transform_4, window_bounds = array<i64: 1, 32>}, {transform_indices = @transform_5, window_bounds = array<i64: 8, 32>}]} {
    %c0 = arith.constant 0 : index
    %c0_0 = arith.constant 0 : index
    %0 = vector.load %arg1[%c0, %c0_0] : memref<8x32xbf16, #tpu.memory_space<vmem>>, vector<8x32xbf16>
    %c0_1 = arith.constant 0 : index
    %c0_2 = arith.constant 0 : index
    %1 = vector.load %arg2[%c0_1, %c0_2] : memref<32x256xbf16, #tpu.memory_space<vmem>>, vector<32x256xbf16>
    %cst = arith.constant dense<0.000000e+00> : vector<8x256xf32>
    %2 = tpu.matmul %0, %1, %cst {dimension_numbers = #tpu.dot_dimension_numbers<[1], [0], [0], [1], [0, 0, 1, 1], [], []>} : vector<8x32xbf16>, vector<32x256xbf16>, vector<8x256xf32> -> vector<8x256xf32>
    %c0_3 = arith.constant 0 : index
    %c0_4 = arith.constant 0 : index
    %3 = vector.load %arg3[%c0_3, %c0_4] : memref<1x256xf32, #tpu.memory_space<vmem>>, vector<1x256xf32>
    %4 = vector.broadcast %3 : vector<1x256xf32> to vector<8x256xf32>
    %5 = arith.addf %2, %4 : vector<8x256xf32>
    %cst_5 = arith.constant 0.000000e+00 : f32
    %6 = vector.broadcast %cst_5 : f32 to vector<8x256xf32>
    %7 = arith.maximumf %5, %6 : vector<8x256xf32>
    %8 = arith.truncf %7 : vector<8x256xf32> to vector<8x256xbf16>
    %c0_6 = arith.constant 0 : index
    %c0_7 = arith.constant 0 : index
    %9 = vector.load %arg4[%c0_6, %c0_7] : memref<256x32xbf16, #tpu.memory_space<vmem>>, vector<256x32xbf16>
    %cst_8 = arith.constant dense<0.000000e+00> : vector<8x32xf32>
    %10 = tpu.matmul %8, %9, %cst_8 {dimension_numbers = #tpu.dot_dimension_numbers<[1], [0], [0], [1], [0, 0, 1, 1], [], []>} : vector<8x256xbf16>, vector<256x32xbf16>, vector<8x32xf32> -> vector<8x32xf32>
    %c0_9 = arith.constant 0 : index
    %c0_10 = arith.constant 0 : index
    %11 = vector.load %arg5[%c0_9, %c0_10] : memref<1x32xf32, #tpu.memory_space<vmem>>, vector<1x32xf32>
    %12 = vector.broadcast %11 : vector<1x32xf32> to vector<8x32xf32>
    %13 = arith.addf %10, %12 : vector<8x32xf32>
    %c0_11 = arith.constant 0 : index
    %c0_12 = arith.constant 0 : index
    %14 = vector.load %arg6[%c0_11, %c0_12] : memref<8x32xf32, #tpu.memory_space<vmem>>, vector<8x32xf32>
    tpu.vector_store %arg6[%c0_11, %c0_12], %13 {strides = array<i32>} : memref<8x32xf32, #tpu.memory_space<vmem>>, vector<8x32xf32>,
    return
  }
  func.func @transform_0(%arg0: i32) -> (i32, i32) {
    %c0_i32 = arith.constant 0 : i32
    %c0_i32_0 = arith.constant 0 : i32
    return %arg0, %c0_i32 : i32, i32
  }
  func.func @transform_1(%arg0: i32) -> (i32, i32) {
    %c0_i32 = arith.constant 0 : i32
    %c0_i32_0 = arith.constant 0 : i32
    %c0_i32_1 = arith.constant 0 : i32
    return %c0_i32, %c0_i32_0 : i32, i32
  }
  func.func @transform_2(%arg0: i32) -> (i32, i32) {
    %c0_i32 = arith.constant 0 : i32
    %c0_i32_0 = arith.constant 0 : i32
    %c0_i32_1 = arith.constant 0 : i32
    return %c0_i32, %c0_i32_0 : i32, i32
  }
  func.func @transform_3(%arg0: i32) -> (i32, i32) {
    %c0_i32 = arith.constant 0 : i32
    %c0_i32_0 = arith.constant 0 : i32
    %c0_i32_1 = arith.constant 0 : i32
    return %c0_i32, %c0_i32_0 : i32, i32
  }
  func.func @transform_4(%arg0: i32) -> (i32, i32) {
    %c0_i32 = arith.constant 0 : i32
    %c0_i32_0 = arith.constant 0 : i32
    %c0_i32_1 = arith.constant 0 : i32
    return %c0_i32, %c0_i32_0 : i32, i32
  }
  func.func @transform_5(%arg0: i32) -> (i32, i32) {
    %c0_i32 = arith.constant 0 : i32
    %c0_i32_0 = arith.constant 0 : i32
    return %arg0, %c0_i32 : i32, i32
  }
}

</mosaic_0001>

<bundles_post_ra>
// kernel: residuals_boost_forward.1
= control target key start
LH: loop header
LB: loop body
LE: loop exit
PB: predicated region body
PF: predicated region fallthrough
CT: control target
= control target key end

     0   :  { %v390_v2 = vmov 0   ;;  %vm59_vm0 = vcmask 261120   ;;  %s505_s0 = inlined_call_operand.vmem [shape: bf16[8,32], index: 0, kind: input, shape index: {}]   ;;  %s506_s1 = inlined_call_operand.vmem [shape: bf16[32,256], index: 1, kind: input, shape index: {}]   ;;  %s507_s2 = inlined_call_operand.vmem [shape: f32[1,256], index: 2, kind: input, shape index: {}]   ;;  %s508_s3 = inlined_call_operand.vmem [shape: bf16[256,32], index: 3, kind: input, shape index: {}]   ;;  %s509_s4 = inlined_call_operand.vmem [shape: f32[1,32], index: 4, kind: input, shape index: {}]   ;;  %s510_s5 = inlined_call_operand.hbm [shape: f32[8,32], index: 5, kind: output, shape index: {}]  }
   0x1   :  { %v344_v0 = vld [vmem:[%s506_s1 + $0x4] ss:$8 sps:$4 sm:$0xff]   ;;  %v346_v1 = vld [vmem:[%s506_s1] ss:$8 sps:$4 sm:$0xff]   ;;  %95 = vmatprep.mubr.bf16.mxu0 %v390_v2  ;;  %v347_v3 = vld [vmem:[%s506_s1 + $0x14] ss:$8 sps:$4 sm:$0xff]  }
   0x2   :  { %63 = vmatprep.subr.bf16.mxu0 %v344_v0  ;;  %v349_v4 = vld [vmem:[%s506_s1 + $0x10] ss:$8 sps:$4 sm:$0xff]   ;;  %v350_v5 = vld [vmem:[%s508_s3 + $0x40] sm:$0xff]   ;;  %v352_v8 = vld [vmem:[%s508_s3 + $0x48] sm:$0xff]  }
   0x3   :  { %64 = vmatpush1.bf16.msra.mxu0 %v346_v1  ;;  %v351_v6 = vld [vmem:[%s508_s3] sm:$0xff]   ;;  %320 = vmatprep.subr.bf16.mxu1 %v350_v5  ;;  %v353_v9 = vld [vmem:[%s508_s3 + $0x8] sm:$0xff]   ;;  %v354_v10 = vld [vmem:[%s508_s3 + $0x50] sm:$0xff]  }
   0x4   :  { %65 = vmatprep.subr.bf16.mxu0 %v347_v3  ;;  %v22_v7 = vld [vmem:[%s505_s0] sm:$0xf]  ;;  %321 = vmatpush3.bf16.msra.mxu1 %v351_v6  ;;  %v355_v11 = vld [vmem:[%s508_s3 + $0x10] sm:$0xff]   ;;  %v356_v12 = vld [vmem:[%s508_s3 + $0x58] sm:$0xff]  }
   0x5   :  { %322 = vmatprep.subr.bf16.mxu1 %v352_v8  ;;  %v357_v13 = vld [vmem:[%s508_s3 + $0x18] sm:$0xff]   ;;  %v358_v14 = vld [vmem:[%s508_s3 + $0x60] sm:$0xff]  }
   0x6   :  { %v359_v15 = vld [vmem:[%s508_s3 + $0x20] sm:$0xff]  }
   0x7   :  { %66 = vmatpush1.bf16.msra.mxu0 %v349_v4 }
   0x8   :  { %323 = vmatpush3.bf16.msra.mxu1 %v353_v9 }
   0x9   :  { %324 = vmatprep.subr.bf16.mxu1 %v354_v10 }
   0xa   :  { %302 = vmatmul.mubr.msk.bf16.vlgmr.msra.gmra.mrb[0].mxu0 %vm59_vm0, %v22_v7 }
   0xc   :  { %325 = vmatpush3.bf16.msra.mxu1 %v355_v11 }
   0xd   :  { %326 = vmatprep.subr.bf16.mxu1 %v356_v12 }
  0x10   :  { %327 = vmatpush3.bf16.msra.mxu1 %v357_v13 }
  0x11   :  { %10 = vsyncpa [#allocation3], 0  ;;  %328 = vmatprep.subr.bf16.mxu1 %v358_v14  ;;  %v360_v16 = vld [vmem:[%s508_s3 + $0x68] sm:$0xff]   ;;  %v362_v18 = vld [vmem:[%s508_s3 + $0x70] sm:$0xff]   ;;  %v29_v22 = vlaneseq }
  0x12   :  { %v361_v17 = vld [vmem:[%s508_s3 + $0x28] sm:$0xff]   ;;  %v363_v19 = vld [vmem:[%s508_s3 + $0x30] sm:$0xff]   ;;  %v364_v20 = vld [vmem:[%s508_s3 + $0x78] sm:$0xff]  }
  0x13   :  { %v365_v21 = vld [vmem:[%s508_s3 + $0x38] sm:$0xff]   ;;  %v30_v23 = vshrl.u32 %v29_v22, 7  ;;  %v27_v25 = vld [vmem:[%s507_s2] sm:$0x3]  ;;  %s391_s2 = smov [#allocation2]  }
  0x14   :  { %329 = vmatpush3.bf16.msra.mxu1 %v359_v15  ;;  %v303_v40 = vld [vmem:[%s509_s4] ss:$0 sm:$0xff]  ;;  %s290_s10 = sshll.u32 %s391_s2, 4  ;;  %s291_s10 = int_to_ptr.vmem [resolvable:$true] %s290_s10 }
  0x15   :  { %330 = vmatprep.subr.bf16.mxu1 %v360_v16  ;;  %v31_v24 = vsub.s32 0, %v30_v23  ;;  %v35_v26 = vsub.s32 1, %v30_v23  ;;  %s366_s11 = scalar_lea.vmem %s291_s10, 128  ;;  %p371_p1 = scmp.lt.s32.totalorder %s291_s10, %s291_s10 }
  0x16   :  { %p367_p0 = scmp.ne.s32.totalorder %s291_s10, %s366_s11  ;;  %p372_p2 = scmp.lt.s32.totalorder %s366_s11, %s366_s11 }
  0x17   :  { %v32_v27 = vrot.slane %v27_v25, %v31_v24  ;;  %v36_v28 = vrot.slane %v27_v25, %v35_v26 }
  0x18   :  { %331 = vmatpush3.bf16.msra.mxu1 %v361_v17  ;;  %p373_p3 = por %p372_p2, %p371_p1 }
  0x19   :  { %332 = vmatprep.subr.bf16.mxu1 %v362_v18 }
  0x1a   :  { %p374_p4 = pnand %p373_p3, %p367_p0 }
  0x1c   :  { %333 = vmatpush3.bf16.msra.mxu1 %v363_v19 }
  0x1d   :  { %334 = vmatprep.subr.bf16.mxu1 %v364_v20 }
  0x20   :  { %335 = vmatpush3.bf16.msra.mxu1 %v365_v21 }
  0xdd   :  { %v97_v29 = vpop.f32.mrb[0].mxu0 }
  0xde   :  { %v98_v30 = vadd.f32 %v97_v29, %v32_v27  ;;  %v99_v31 = vpop.f32.mrb[1].mxu0 }
  0xdf   :  { %v100_v32 = vadd.f32 %v99_v31, %v36_v28  ;;  %v101_v33 = vpop.f32.mrb[2].mxu0 }
  0xe0   :  { %v104_v34 = vmax.f32 %v98_v30, 0.0  ;;  %v102_v35 = vpop.f32.mrb[3].mxu0 }
  0xe1   :  { %v105_v36 = vmax.f32 %v100_v32, 0.0 }
  0xe2   :  { %v106_v38 = vpack.c.bf16 %v104_v34, %v104_v34 }
  0xe3   :  { %v107_v37 = vpack.c.bf16 %v105_v36, %v105_v36 }
  0xe5   :  { %275 = vmatprep.mubr.bf16.mxu1 %v107_v37 }
  0xe6   :  { %276 = vmatmul.mubr.bf16.vlgmr.msra.gmra.mrb[0].mxu1 %v106_v38 }
 0x1b9   :  { %v336_v39 = vpop.f32.mrb[0].mxu1 }
 0x1ba   :  { %v337_v41 = vpop.f32.mrb[1].mxu1 }
 0x1bb   :  { %v338_v42 = vadd.f32 %v337_v41, %v336_v39  ;;  %v339_v43 = vpop.f32.mrb[2].mxu1 }
 0x1bc   :  { %v340_v44 = vpop.f32.mrb[3].mxu1 }
 0x1bd   :  { %v278_v45 = vadd.f32 %v338_v42, %v303_v40 }
 0x1bf   :  { %283 = vst.msk [vmem:[#allocation2] sm:$0xff] %vm59_vm0, %v278_v45 }
 0x1c0   :  { %377 = shalt.err (!%p374_p4)
}
 0x1c1   :  { %s378_s4 = scalar_lea.hbm %s510_s5, 128 }
 0x1c2   :  { %p379_p5 = scmp.ne.s32.totalorder %s510_s5, %s378_s4  ;;  %p382_p6 = scmp.lt.u32.totalorder %s378_s4, %s510_s5 }
 0x1c4   :  { %p384_p7 = pnand %p382_p6, %p379_p5 }
 0x1c6   :  { %387 = shalt.err (!%p384_p7)
}
 0x1c7   :  { %293 = dma.vmem_to_hbm [thread:$0]  %s291_s10, 128, %s510_s5, [#allocation3]  }
 0x1c8   :  { %388 = dma.done.wait [#allocation3], 128  }
 0x1c9   :  { %389 = vsyncadd [#allocation3], 4294967168 }
 0x1ca   :  { %297 = vsyncpa [#allocation3], 1 }

</bundles_post_ra>
